<compile_context>
chip_gen: v6e
topology: v6e:2x2x1
jax: 0.10.0
libtpu: 0.0.40
codegen_flags: <defaults>
</compile_context>

<pallas_src>
import functools

import numpy as np
import jax
import jax.numpy as jnp
from jax.experimental import pallas as pl
from jax.experimental.pallas import tpu as pltpu

LANE = 128      # lane-dense embedding width (emb_dim padded up to a multiple)
TM_ENT = 32     # entity rows per tile       (demo-sized; grow to 256+ in prod)
TE_EDGE = 128   # edges per reduction block  (demo-sized; grow to 512+ in prod)
TR_UI = 16      # user/item rows per tile
# NOTE: production tile sizes must be budgeted against VMEM (64 MiB on v7x,
# 128 MiB on v5e/v6e) counting 2x per double-buffered input plus scratch.

_VMEM = pl.BlockSpec(memory_space=pltpu.MemorySpace.VMEM)
_SMEM = pl.BlockSpec(memory_space=pltpu.MemorySpace.SMEM)


# --------------------------------------------------------------------------
# Kernel 1: KG aggregation (segmented scatter_mean) fused with F.normalize and
# the residual add.
#   entity_agg = scatter_mean(entity_emb[tail] * rel_emb, head)
#   entity_emb = normalize(entity_agg); entity_res += entity_emb
# Grid: (entity_tile [parallel], edge_block_within_tile [arbitrary]).
# Edges are pre-sorted by head; blk_start/blk_count (scalar prefetch) give each
# entity tile its window of edge blocks.  Each step builds a local [TM, TE]
# one-hot and accumulates onehot @ (tail*rel) on the MXU into VMEM scratch.
# --------------------------------------------------------------------------
def _kg_agg_kernel(blk_start_ref, blk_count_ref,            # scalar prefetch
                   inv_cnt_ref, head_ref, src_ref, res_ref,  # inputs
                   ent_out_ref, res_out_ref,                 # outputs
                   acc_ref, *, tm, te):
    i = pl.program_id(0)   # entity row tile
    k = pl.program_id(1)   # edge block step inside this tile's window

    @pl.when(k == 0)
    def _init():
        acc_ref[...] = jnp.zeros_like(acc_ref)

    @pl.when(k < blk_count_ref[i])
    def _accumulate():
        heads = head_ref[...]                                        # [1, TE] i32
        rows = jax.lax.broadcasted_iota(jnp.int32, (tm, te), 0) + i * tm
        onehot = (rows == heads).astype(jnp.float32)                 # [TM, TE]
        acc_ref[...] += jnp.dot(onehot, src_ref[...],
                                preferred_element_type=jnp.float32)

    @pl.when(k == pl.num_programs(1) - 1)
    def _finalize():
        mean = acc_ref[...] * inv_cnt_ref[...]           # scatter_mean
        ssq = jnp.sum(mean * mean, axis=1, keepdims=True)
        # F.normalize(eps=1e-12): x / max(||x||, 1e-12); rsqrt goes to the EUP.
        normed = mean * jax.lax.rsqrt(jnp.maximum(ssq, 1e-24))
        ent_out_ref[...] = normed
        res_out_ref[...] = res_ref[...] + normed


def kg_aggregate(blk_start, blk_count, kmax, inv_cnt, head_row, src, ent_res,
                 *, tm=TM_ENT, te=TE_EDGE):
    n_ent_p, d = ent_res.shape
    nblocks = src.shape[0] // te
    n_tiles = n_ent_p // tm

    def _edge_blk(i, k, bs, bc):
        return (jnp.minimum(bs[i] + k, nblocks - 1), 0)

    def _head_blk(i, k, bs, bc):
        return (0, jnp.minimum(bs[i] + k, nblocks - 1))

    def _row_blk(i, k, bs, bc):
        return (i, 0)

    kern = functools.partial(_kg_agg_kernel, tm=tm, te=te)
    out = jax.ShapeDtypeStruct((n_ent_p, d), jnp.float32)
    return pl.pallas_call(
        kern,
        out_shape=(out, out),
        grid_spec=pltpu.PrefetchScalarGridSpec(
            num_scalar_prefetch=2,
            grid=(n_tiles, kmax),
            in_specs=[
                pl.BlockSpec((tm, 1), _row_blk),    # inv counts
                pl.BlockSpec((1, te), _head_blk),   # sorted head ids (lane major)
                pl.BlockSpec((te, d), _edge_blk),   # sorted tail*rel messages
                pl.BlockSpec((tm, d), _row_blk),    # entity residual (epilogue)
            ],
            out_specs=(pl.BlockSpec((tm, d), _row_blk),
                       pl.BlockSpec((tm, d), _row_blk)),
            scratch_shapes=[pltpu.VMEM((tm, d), jnp.float32)],
        ),
        compiler_params=pltpu.CompilerParams(
            dimension_semantics=("parallel", "arbitrary")),
    )(blk_start, blk_count, inv_cnt, head_row, src, ent_res)


# --------------------------------------------------------------------------
# Kernel 2: fused user+item aspect aggregation + normalize + residual update.
#   agg = interact_mat @ aspect_emb
#   (torch: agg * softmax(x @ aspect.T).sum(1) + agg  ==  2 * agg exactly,
#    since softmax rows sum to 1 -> the whole score path is dead compute)
#   res += normalize(2 * agg)
# Users and items share one row-tiled grid over the concatenated row space.
# --------------------------------------------------------------------------
def _aspect_agg_kernel(interact_ref, aspect_ref, res_ref, res_out_ref):
    agg = 2.0 * jnp.dot(interact_ref[...], aspect_ref[...],
                        preferred_element_type=jnp.float32)
    ssq = jnp.sum(agg * agg, axis=1, keepdims=True)
    normed = agg * jax.lax.rsqrt(jnp.maximum(ssq, 1e-24))   # F.normalize
    res_out_ref[...] = res_ref[...] + normed


def aspect_aggregate_update(interact, aspect_emb, res, *, tr=TR_UI):
    n, a = interact.shape
    d = aspect_emb.shape[1]
    return pl.pallas_call(
        _aspect_agg_kernel,
        out_shape=jax.ShapeDtypeStruct((n, d), jnp.float32),
        grid_spec=pltpu.PrefetchScalarGridSpec(
            num_scalar_prefetch=0,
            grid=(n // tr,),
            in_specs=[
                pl.BlockSpec((tr, a), lambda r: (r, 0)),
                pl.BlockSpec((a, d), lambda r: (0, 0)),
                pl.BlockSpec((tr, d), lambda r: (r, 0)),
            ],
            out_specs=pl.BlockSpec((tr, d), lambda r: (r, 0)),
        ),
        compiler_params=pltpu.CompilerParams(dimension_semantics=("parallel",)),
    )(interact, aspect_emb, res)


# --------------------------------------------------------------------------
# Kernel 3: BPR loss (small batch -> single block).
#   mf_loss  = -mean(logsigmoid(pos - neg))
#   emb_loss = decay * (||u||^2 + ||p||^2 + ||n||^2) / 2 / batch
# --------------------------------------------------------------------------
def _bpr_kernel(u_ref, p_ref, n_ref, tot_ref, mf_ref, emb_ref, *,
                decay, batch_size):
    u = u_ref[...]
    p = p_ref[...]
    n = n_ref[...]
    pos = jnp.sum(u * p, axis=1, keepdims=True)
    neg = jnp.sum(u * n, axis=1, keepdims=True)
    x = pos - neg
    # numerically stable log-sigmoid: min(x,0) - log(1 + exp(-|x|))
    logsig = jnp.minimum(x, 0.0) - jnp.log(1.0 + jnp.exp(-jnp.abs(x)))
    mf = -jnp.sum(logsig) / batch_size
    reg = (jnp.sum(u * u) + jnp.sum(p * p) + jnp.sum(n * n)) * 0.5
    emb = decay * reg / batch_size
    mf_ref[0] = mf
    emb_ref[0] = emb
    tot_ref[0] = mf + emb


def bpr_loss(u_e, pos_e, neg_e, decay):
    b = u_e.shape[0]
    kern = functools.partial(_bpr_kernel, decay=float(decay),
                             batch_size=float(b))
    out_shape = tuple(jax.ShapeDtypeStruct((1,), jnp.float32) for _ in range(3))
    tot, mf, emb = pl.pallas_call(
        kern,
        out_shape=out_shape,
        in_specs=[_VMEM, _VMEM, _VMEM],
        out_specs=(_SMEM, _SMEM, _SMEM),
    )(u_e, pos_e, neg_e)
    return tot[0], mf[0], emb[0]


# --------------------------------------------------------------------------
# Padding / static-schedule helpers (hop-invariant, run once).
# --------------------------------------------------------------------------
def _pad_rows(x, multiple):
    pad = (-x.shape[0]) % multiple
    if pad:
        x = jnp.concatenate([x, jnp.zeros((pad,) + x.shape[1:], x.dtype)], axis=0)
    return x


def _pad_lanes(x, multiple=LANE):
    pad = (-x.shape[1]) % multiple
    if pad:
        x = jnp.concatenate([x, jnp.zeros((x.shape[0], pad), x.dtype)], axis=1)
    return x


def _build_kg_schedule(head, tail, rel, n_ent_p, tm, te):
    """Sort edges by head and derive per-entity-tile edge-block windows.
    head/tail/edge_type never change across hops, so this runs once."""
    n_edges = int(head.shape[0])
    pad_e = (-n_edges) % te
    # padded edges get head = n_ent_p (never matches any tile row) -> inert.
    head_p = jnp.concatenate(
        [head.astype(jnp.int32), jnp.full((pad_e,), n_ent_p, jnp.int32)])
    tail_p = jnp.concatenate(
        [tail.astype(jnp.int32), jnp.zeros((pad_e,), jnp.int32)])
    rel_p = jnp.concatenate(
        [rel, jnp.zeros((pad_e, rel.shape[1]), rel.dtype)], axis=0)

    order = jnp.argsort(head_p)
    sorted_head = head_p[order]
    sorted_tail = tail_p[order]
    sorted_rel = rel_p[order]

    sh = np.asarray(sorted_head)                 # static host-side metadata
    n_tiles = n_ent_p // tm
    starts = np.searchsorted(sh, np.arange(n_tiles) * tm, side="left")
    ends = np.searchsorted(sh, (np.arange(n_tiles) + 1) * tm, side="left")
    blk_start = (starts // te).astype(np.int32)
    blk_end = np.where(ends > starts, -(-ends // te), blk_start).astype(np.int32)
    blk_count = (blk_end - blk_start).astype(np.int32)
    kmax = max(int(blk_count.max()), 1)

    return (jnp.asarray(blk_start), jnp.asarray(blk_count), kmax,
            sorted_head.reshape(1, -1), sorted_tail, sorted_rel)


# --------------------------------------------------------------------------
# Model wrapper (GraphConv + Recommender.forward glue)
# --------------------------------------------------------------------------
def recommender_forward(params, batch):
    # lane-pad every embedding table to a multiple of 128 (zero lanes are inert
    # for matmuls, norms, residuals and the BPR dot products).
    user_emb = _pad_lanes(params["user_embed"])
    item_emb = _pad_lanes(params["item_embed"])
    entity_emb = _pad_lanes(params["entity_emb"])
    aspect_emb = _pad_lanes(params["aspect_emb"])
    weight = _pad_lanes(params["rel_weight"])

    head, tail = params["edge_index"]
    edge_type = params["edge_type"]
    n_users = user_emb.shape[0]
    n_items = item_emb.shape[0]

    # ---- hop-invariant preprocessing (runs once) ---------------------------
    entity_emb = _pad_rows(entity_emb, TM_ENT)
    n_ent_p = entity_emb.shape[0]
    rel = weight[edge_type - 2]                  # relation gather hoisted
    (blk_start, blk_count, kmax,
     sorted_head_row, sorted_tail, sorted_rel) = _build_kg_schedule(
        head, tail, rel, n_ent_p, TM_ENT, TE_EDGE)

    counts = jnp.zeros((n_ent_p,), jnp.float32).at[head].add(1.0)
    inv_cnt = jnp.where(counts > 0.0, 1.0 / jnp.maximum(counts, 1.0),
                        0.0).reshape(-1, 1)      # scatter_mean denominators

    # fused user+item aspect aggregation operands (constant across hops)
    ui_interact = _pad_rows(
        jnp.concatenate([params["ua_mat"], params["ia_mat"]], axis=0)
        .astype(jnp.float32), TR_UI)
    ui_res = _pad_rows(jnp.concatenate([user_emb, item_emb], axis=0), TR_UI)

    entity_res = entity_emb

    for _ in range(params["context_hops"]):
        # TODO(synk): entity_emb[tail] gather stays in JAX glue; an in-kernel
        # DMA gather of scalar-prefetched tail ids would avoid this [E, D] temp.
        src = entity_emb[sorted_tail] * sorted_rel
        entity_emb, entity_res = kg_aggregate(
            blk_start, blk_count, kmax, inv_cnt, sorted_head_row, src,
            entity_res)
        # Per-hop user/item embeddings only ever fed the softmax score path,
        # whose row-sum is identically 1 -> they cannot influence any output,
        # so only the residual accumulators are carried.
        ui_res = aspect_aggregate_update(ui_interact, aspect_emb, ui_res)
        # mess_dropout=False / node_dropout=False -> deterministic forward.

    user_res = ui_res[:n_users]
    item_res = ui_res[n_users:n_users + n_items]
    item_final = params["W1"] * entity_res[:n_items] + params["W2"] * item_res

    u_e = user_res[batch["users"]]
    pos_e = item_final[batch["pos_items"]]
    neg_e = item_final[batch["neg_items"]]
    return bpr_loss(u_e, pos_e, neg_e, params["decay"])


def xavier_uniform(key, shape):
    bound = (6.0 / (shape[0] + shape[1])) ** 0.5
    return jax.random.uniform(key, shape, jnp.float32, -bound, bound)


if __name__ == "__main__":
    # Small, deterministic synthetic configuration.
    n_users, n_items, n_entities = 64, 48, 96
    n_aspects, n_relations = 8, 6
    n_edges, emb_size = 512, 64
    context_hops, batch_size = 2, 16
    decay = 1e-5

    key = jax.random.PRNGKey(0)
    keys = jax.random.split(key, 13)

    user_embed = xavier_uniform(keys[0], (n_users, emb_size))
    item_embed = xavier_uniform(keys[1], (n_items, emb_size))
    entity_emb = xavier_uniform(keys[2], (n_entities, emb_size))
    aspect_emb = xavier_uniform(keys[3], (n_aspects, emb_size))
    rel_weight = xavier_uniform(keys[4], (n_relations - 2, emb_size))

    head = jax.random.randint(keys[5], (n_edges,), 0, n_entities)
    tail = jax.random.randint(keys[6], (n_edges,), 0, n_entities)
    edge_type = jax.random.randint(keys[7], (n_edges,), 2, n_relations)

    # dense stand-ins for the sparse user-aspect / item-aspect interaction mats
    ua_mat = ((jax.random.uniform(keys[8], (n_users, n_aspects)) < 0.5)
              .astype(jnp.float32)
              * jax.random.uniform(keys[8], (n_users, n_aspects),
                                   jnp.float32, 0.1, 1.0))
    ia_mat = ((jax.random.uniform(keys[9], (n_items, n_aspects)) < 0.5)
              .astype(jnp.float32)
              * jax.random.uniform(keys[9], (n_items, n_aspects),
                                   jnp.float32, 0.1, 1.0))

    params = dict(
        user_embed=user_embed, item_embed=item_embed, entity_emb=entity_emb,
        aspect_emb=aspect_emb, rel_weight=rel_weight,
        edge_index=(head, tail), edge_type=edge_type,
        ua_mat=ua_mat, ia_mat=ia_mat,
        W1=jnp.float32(1.0), W2=jnp.float32(1.0),
        context_hops=context_hops, decay=decay,
    )

    batch = dict(
        users=jax.random.randint(keys[10], (batch_size,), 0, n_users),
        pos_items=jax.random.randint(keys[11], (batch_size,), 0, n_items),
        neg_items=jax.random.randint(keys[12], (batch_size,), 0, n_items),
    )

    total_loss, mf_loss, emb_loss = recommender_forward(params, batch)
    jax.block_until_ready((total_loss, mf_loss, emb_loss))
    assert jnp.isfinite(total_loss) and jnp.isfinite(mf_loss) and jnp.isfinite(emb_loss)
    print("KERNEL_OK")
</pallas_src>

<mosaic_0001>
module attributes {stable_mosaic.version = 11 : i64} {
  func.func @_kg_agg_kernel(%arg0: i32, %arg1: i32, %arg2: memref<3xi32, #tpu.memory_space<smem>>, %arg3: memref<3xi32, #tpu.memory_space<smem>>, %arg4: memref<32x1xf32, #tpu.memory_space<vmem>>, %arg5: memref<1x128xi32, #tpu.memory_space<vmem>>, %arg6: memref<128x128xf32, #tpu.memory_space<vmem>>, %arg7: memref<32x128xf32, #tpu.memory_space<vmem>>, %arg8: memref<32x128xf32, #tpu.memory_space<vmem>>, %arg9: memref<32x128xf32, #tpu.memory_space<vmem>>, %arg10: memref<32x128xf32, #tpu.memory_space<vmem>>) attributes {dimension_semantics = [#tpu.dimension_semantics<parallel>, #tpu.dimension_semantics<arbitrary>], iteration_bounds = array<i64: 3, 2>, scalar_prefetch = 2 : i64, scratch_operands = 1 : i64, tpu.core_type = #tpu.core_type<tc>, window_params = [{transform_indices = @transform_0, window_bounds = array<i64: 32, 1>}, {transform_indices = @transform_1, window_bounds = array<i64: 1, 128>}, {transform_indices = @transform_2, window_bounds = array<i64: 128, 128>}, {transform_indices = @transform_3, window_bounds = array<i64: 32, 128>}, {transform_indices = @transform_4, window_bounds = array<i64: 32, 128>}, {transform_indices = @transform_5, window_bounds = array<i64: 32, 128>}]} {
    %c0_i32 = arith.constant 0 : i32
    %0 = arith.cmpi eq, %arg1, %c0_i32 : i32
    %1 = arith.extui %0 : i1 to i32
    %c0_i32_0 = arith.constant 0 : i32
    %2 = arith.cmpi ne, %1, %c0_i32_0 : i32
    scf.if %2 {
      %cst = arith.constant 0.000000e+00 : f32
      %11 = vector.broadcast %cst : f32 to vector<32x128xf32>
      %c0 = arith.constant 0 : index
      %c0_3 = arith.constant 0 : index
      %12 = vector.load %arg10[%c0, %c0_3] : memref<32x128xf32, #tpu.memory_space<vmem>>, vector<32x128xf32>
      tpu.vector_store %arg10[%c0, %c0_3], %11 {strides = array<i32>} : memref<32x128xf32, #tpu.memory_space<vmem>>, vector<32x128xf32>,
    } else {
    }
    %3 = arith.index_cast %arg0 : i32 to index
    %4 = memref.load %arg3[%3] : memref<3xi32, #tpu.memory_space<smem>>
    %5 = arith.cmpi slt, %arg1, %4 : i32
    %6 = arith.extui %5 : i1 to i32
    %c0_i32_1 = arith.constant 0 : i32
    %7 = arith.cmpi ne, %6, %c0_i32_1 : i32
    scf.if %7 {
      %c0 = arith.constant 0 : index
      %c0_3 = arith.constant 0 : index
      %11 = vector.load %arg5[%c0, %c0_3] : memref<1x128xi32, #tpu.memory_space<vmem>>, vector<1x128xi32>
      %12 = tpu.iota {dimensions = array<i32: 0>} : vector<32x128xi32>
      %c32_i32 = arith.constant 32 : i32
      %13 = arith.muli %arg0, %c32_i32 : i32
      %14 = vector.broadcast %13 : i32 to vector<32x128xi32>
      %15 = arith.addi %12, %14 : vector<32x128xi32>
      %16 = vector.broadcast %11 : vector<1x128xi32> to vector<32x128xi32>
      %17 = arith.cmpi eq, %15, %16 : vector<32x128xi32>
      %18 = arith.extui %17 : vector<32x128xi1> to vector<32x128xi32>
      %19 = arith.sitofp %18 : vector<32x128xi32> to vector<32x128xf32>
      %c0_4 = arith.constant 0 : index
      %c0_5 = arith.constant 0 : index
      %20 = vector.load %arg10[%c0_4, %c0_5] : memref<32x128xf32, #tpu.memory_space<vmem>>, vector<32x128xf32>
      %c0_6 = arith.constant 0 : index
      %c0_7 = arith.constant 0 : index
      %21 = vector.load %arg6[%c0_6, %c0_7] : memref<128x128xf32, #tpu.memory_space<vmem>>, vector<128x128xf32>
      %cst = arith.constant dense<0.000000e+00> : vector<32x128xf32>
      %22 = tpu.matmul %19, %21, %cst {dimension_numbers = #tpu.dot_dimension_numbers<[1], [0], [0], [1], [0, 0, 1, 1], [], []>} : vector<32x128xf32>, vector<128x128xf32>, vector<32x128xf32> -> vector<32x128xf32>
      %23 = arith.addf %20, %22 : vector<32x128xf32>
      %c0_8 = arith.constant 0 : index
      %c0_9 = arith.constant 0 : index
      %24 = vector.load %arg10[%c0_8, %c0_9] : memref<32x128xf32, #tpu.memory_space<vmem>>, vector<32x128xf32>
      tpu.vector_store %arg10[%c0_8, %c0_9], %23 {strides = array<i32>} : memref<32x128xf32, #tpu.memory_space<vmem>>, vector<32x128xf32>,
    } else {
    }
    %c1_i32 = arith.constant 1 : i32
    %8 = arith.cmpi eq, %arg1, %c1_i32 : i32
    %9 = arith.extui %8 : i1 to i32
    %c0_i32_2 = arith.constant 0 : i32
    %10 = arith.cmpi ne, %9, %c0_i32_2 : i32
    scf.if %10 {
      %c0 = arith.constant 0 : index
      %c0_3 = arith.constant 0 : index
      %11 = vector.load %arg10[%c0, %c0_3] : memref<32x128xf32, #tpu.memory_space<vmem>>, vector<32x128xf32>
      %c0_4 = arith.constant 0 : index
      %c0_5 = arith.constant 0 : index
      %12 = vector.load %arg4[%c0_4, %c0_5] : memref<32x1xf32, #tpu.memory_space<vmem>>, vector<32x1xf32>
      %13 = vector.broadcast %12 : vector<32x1xf32> to vector<32x128xf32>
      %14 = arith.mulf %11, %13 : vector<32x128xf32>
      %15 = arith.mulf %14, %14 : vector<32x128xf32>
      %cst = arith.constant dense<0.000000e+00> : vector<32xf32>
      %16 = vector.multi_reduction <add>, %15, %cst [1] : vector<32x128xf32> to vector<32xf32>
      %17 = vector.shape_cast %16 : vector<32xf32> to vector<32x1xf32>
      %cst_6 = arith.constant 1.000000e-24 : f32
      %18 = vector.broadcast %cst_6 : f32 to vector<32x1xf32>
      %19 = arith.maximumf %17, %18 : vector<32x1xf32>
      %20 = math.rsqrt %19 : vector<32x1xf32>
      %21 = vector.broadcast %20 : vector<32x1xf32> to vector<32x128xf32>
      %22 = arith.mulf %14, %21 : vector<32x128xf32>
      %c0_7 = arith.constant 0 : index
      %c0_8 = arith.constant 0 : index
      %23 = vector.load %arg8[%c0_7, %c0_8] : memref<32x128xf32, #tpu.memory_space<vmem>>, vector<32x128xf32>
      tpu.vector_store %arg8[%c0_7, %c0_8], %22 {strides = array<i32>} : memref<32x128xf32, #tpu.memory_space<vmem>>, vector<32x128xf32>,
      %c0_9 = arith.constant 0 : index
      %c0_10 = arith.constant 0 : index
      %24 = vector.load %arg7[%c0_9, %c0_10] : memref<32x128xf32, #tpu.memory_space<vmem>>, vector<32x128xf32>
      %25 = arith.addf %24, %22 : vector<32x128xf32>
      %c0_11 = arith.constant 0 : index
      %c0_12 = arith.constant 0 : index
      %26 = vector.load %arg9[%c0_11, %c0_12] : memref<32x128xf32, #tpu.memory_space<vmem>>, vector<32x128xf32>
      tpu.vector_store %arg9[%c0_11, %c0_12], %25 {strides = array<i32>} : memref<32x128xf32, #tpu.memory_space<vmem>>, vector<32x128xf32>,
    } else {
    }
    return
  }
  func.func @transform_0(%arg0: i32, %arg1: i32, %arg2: memref<3xi32, #tpu.memory_space<smem>>, %arg3: memref<3xi32, #tpu.memory_space<smem>>) -> (i32, i32) {
    %c0_i32 = arith.constant 0 : i32
    %c0_i32_0 = arith.constant 0 : i32
    return %arg0, %c0_i32 : i32, i32
  }
  func.func @transform_1(%arg0: i32, %arg1: i32, %arg2: memref<3xi32, #tpu.memory_space<smem>>, %arg3: memref<3xi32, #tpu.memory_space<smem>>) -> (i32, i32) {
    %0 = arith.index_cast %arg0 : i32 to index
    %1 = memref.load %arg2[%0] : memref<3xi32, #tpu.memory_space<smem>>
    %2 = arith.addi %1, %arg1 : i32
    %c3_i32 = arith.constant 3 : i32
    %3 = arith.minsi %2, %c3_i32 : i32
    %c0_i32 = arith.constant 0 : i32
    %c0_i32_0 = arith.constant 0 : i32
    return %c0_i32, %3 : i32, i32
  }
  func.func @transform_2(%arg0: i32, %arg1: i32, %arg2: memref<3xi32, #tpu.memory_space<smem>>, %arg3: memref<3xi32, #tpu.memory_space<smem>>) -> (i32, i32) {
    %0 = arith.index_cast %arg0 : i32 to index
    %1 = memref.load %arg2[%0] : memref<3xi32, #tpu.memory_space<smem>>
    %2 = arith.addi %1, %arg1 : i32
    %c3_i32 = arith.constant 3 : i32
    %3 = arith.minsi %2, %c3_i32 : i32
    %c0_i32 = arith.constant 0 : i32
    %c0_i32_0 = arith.constant 0 : i32
    return %3, %c0_i32 : i32, i32
  }
  func.func @transform_3(%arg0: i32, %arg1: i32, %arg2: memref<3xi32, #tpu.memory_space<smem>>, %arg3: memref<3xi32, #tpu.memory_space<smem>>) -> (i32, i32) {
    %c0_i32 = arith.constant 0 : i32
    %c0_i32_0 = arith.constant 0 : i32
    return %arg0, %c0_i32 : i32, i32
  }
  func.func @transform_4(%arg0: i32, %arg1: i32, %arg2: memref<3xi32, #tpu.memory_space<smem>>, %arg3: memref<3xi32, #tpu.memory_space<smem>>) -> (i32, i32) {
    %c0_i32 = arith.constant 0 : i32
    %c0_i32_0 = arith.constant 0 : i32
    return %arg0, %c0_i32 : i32, i32
  }
  func.func @transform_5(%arg0: i32, %arg1: i32, %arg2: memref<3xi32, #tpu.memory_space<smem>>, %arg3: memref<3xi32, #tpu.memory_space<smem>>) -> (i32, i32) {
    %c0_i32 = arith.constant 0 : i32
    %c0_i32_0 = arith.constant 0 : i32
    return %arg0, %c0_i32 : i32, i32
  }
}

</mosaic_0001>

<bundles_post_ra>
// kernel: tpu_custom_call.1
= control target key start
LH: loop header
LB: loop body
LE: loop exit
PB: predicated region body
PF: predicated region fallthrough
CT: control target
= control target key end

     0   :  { %s1657_s0 = inlined_call_operand.vmem [shape: s32[3], index: 0, kind: input, shape index: {}]   ;;  %s1658_s2 = inlined_call_operand.vmem [shape: f32[96,1], index: 2, kind: input, shape index: {}]   ;;  %s1659_s3 = inlined_call_operand.vmem [shape: s32[1,512], index: 3, kind: input, shape index: {}]   ;;  %s1660_s4 = inlined_call_operand.hbm [shape: f32[512,128], index: 4, kind: input, shape index: {}]   ;;  %s1661_s5 = inlined_call_operand.vmem [shape: f32[96,128], index: 5, kind: input, shape index: {}]   ;;  %s1662_s6 = inlined_call_operand.hbm [shape: f32[96,128], index: 6, kind: output, shape index: {0}]   ;;  %s1663_s7 = inlined_call_operand.hbm [shape: f32[96,128], index: 7, kind: output, shape index: {1}]   ;;  %s1664_s1 = inlined_call_operand.vmem [shape: s32[3], index: 1, kind: input, shape index: {}]  }
   0x1   :  { %s13_s26 = sshll.u32 %s1657_s0, 4  ;;  %s17_s29 = sshll.u32 %s1664_s1, 4  ;;  %s14_s26 = int_to_ptr.vmem [resolvable:$true] %s13_s26  ;;  %s18_s29 = int_to_ptr.vmem [resolvable:$true] %s17_s29 }
   0x2   :  { %s1059_s30 = scalar_lea.vmem %s14_s26, 16  ;;  %p1064_p1 = scmp.lt.s32.totalorder %s14_s26, %s14_s26 }
   0x3   :  { %p1060_p0 = scmp.ne.s32.totalorder %s14_s26, %s1059_s30  ;;  %p1065_p2 = scmp.lt.s32.totalorder %s1059_s30, %s1059_s30 }
   0x5   :  { %p1066_p3 = por %p1065_p2, %p1064_p1 }
   0x7   :  { %p1067_p4 = pnand %p1066_p3, %p1060_p0 }
   0x9   :  { %1070 = shalt.err (!%p1067_p4)  }
   0xa   :  { %s1265_s8 = smov [#allocation4]   ;;  %s1071_s9 = scalar_lea.vmem %s18_s29, 16 }
   0xb   :  { %16 = dma.vmem_to_smem %s14_s26, 16, %s1265_s8, [#allocation3] }
   0xc   :  { %p1072_p5 = scmp.ne.s32.totalorder %s18_s29, %s1071_s9  ;;  %p1076_p6 = scmp.lt.s32.totalorder %s18_s29, %s18_s29 }
   0xd   :  { %p1077_p7 = scmp.lt.s32.totalorder %s1071_s9, %s1071_s9 }
   0xf   :  { %p1078_p8 = por %p1077_p7, %p1076_p6 }
  0x11   :  { %p1079_p9 = pnand %p1078_p8, %p1072_p5 }
  0x13   :  { %1082 = shalt.err (!%p1079_p9)  }
  0x14   :  { %s1266_s0 = smov [#allocation5]  }
  0x15   :  { %20 = dma.vmem_to_smem %s18_s29, 16, %s1266_s0, [#allocation3] }
  0x16   :  { %1207 = dma.done.wait [#allocation3], 32 }
  0x17   :  { %1208 = vsyncadd [#allocation3], 4294967264 }
  0x18   :  { %22 = sfence }
  0x19   :  { %23 = vsyncpa [#allocation7], 0 }
  0x1a   :  { %25 = vsyncpa [#allocation7 + $0x1], 0 }
  0x1b   :  { %26 = vsyncpa [#allocation8], 0 }
  0x1c   :  { %28 = vsyncpa [#allocation8 + $0x1], 0 }
  0x1d   :  { %29 = vsyncpa [#allocation11], 0 }
  0x1e   :  { %31 = vsyncpa [#allocation11 + $0x1], 0  ;;  %s1323_s1 = smov 0   ;;  %s1325_s10 = smov 0  }
  0x1f   :  { %s1327_s11 = smov 0   ;;  %s1329_s12 = smov 0  }
  0x20   :  { %s1331_s13 = smov 0   ;;  %s1333_s14 = smov 0  }
  0x21   :  { %s1335_s15 = smov 0   ;;  %s1337_s16 = smov 0  }
  0x22   :  { %s1339_s17 = smov 0   ;;  %s1341_s18 = smov 0  }
  0x23   :  { %s1343_s19 = smov 0  }
  0x24 LB: > { %1672 = sst [smem:[#allocation18_spill]] %s1231_s11  ;;  %s797_s20 = sadd.s32 4294967295, %s1263_s19   ;;  %s1263_s19 = sphi %s1343_s19, %s37_s19   ;;  %s1259_s18 = sphi %s1341_s18, %s1695_s18   ;;  %s1255_s17 = sphi %s1339_s17, %s1694_s17   ;;  %s1251_s16 = sphi %s1337_s16, %s1693_s16   ;;  %s1247_s15 = sphi %s1335_s15, %s1692_s15   ;;  %s1243_s14 = sphi %s1333_s14, %s1700_s14   ;;  %s1239_s13 = sphi %s1331_s13, %s1699_s13   ;;  %s1235_s12 = sphi %s1329_s12, %s1698_s12   ;;  %s1231_s11 = sphi %s1327_s11, %s1690_s11   ;;  %s1227_s10 = sphi %s1325_s10, %s1697_s10   ;;  %s1223_s1 = sphi %s1323_s1, %s1696_s1  }
  0x25   : > { %1673 = sst [smem:[#allocation19_spill]] %s1255_s17  ;;  %s46_s21 = sadd.s32 1, %s1255_s17 }
  0x26   : > { %1674 = sst [smem:[#allocation20_spill]] %s1259_s18  ;;  %s49_s22 = sadd.s32 1, %s1259_s18 }
  0x27   : > { %p47_p10 = scmp.ge.s32.totalorder %s46_s21, 2  ;;  %s113_s23 = sld [smem:[#allocation4 + %s1259_s18]] }
  0x28   : > { %s798_s24 = sadd.s32 4294967294, %s1263_s19   ;;  %p131_p11 = scmp.ne.s32.totalorder %s1243_s14, %s1239_s13 }
  0x29   : > { %s1702_s21 = smov (%p47_p10, %s46_s21), 0  ;;  %s1704_s22 = smov (!%p47_p10, %s49_s22), %s1259_s18 }
  0x2a   : > { %1675 = sst [smem:[#allocation21_spill]] %s1702_s21  ;;  %p132_p12 = scmp.eq.s32.totalorder %s1263_s19, 0 }
  0x2b   : > { %p137_p13 = scmp.ne.s32.totalorder %s1239_s13, %s1235_s12  ;;  %p51_p0 = scmp.ge.s32.totalorder %s1704_s22, 3 }
  0x2c   : > { %p138_p1 = scmp.eq.s32.totalorder %s797_s20, 0  ;;  %p1389_p2 = por %p132_p12, %p131_p11 }
  0x2d   : > { %s114_s25 = sadd.s32 %s1255_s17, %s113_s23  ;;  %s1706_s22 = smov (%p51_p0, %s1704_s22), 0 }
  0x2e   : > { %1677 = sst [smem:[#allocation22_spill]] %s1706_s22  ;;  %p115_p3 = scmp.lt.s32.totalorder %s114_s25, 3 }
  0x2f   : > { %p1395_p4 = por %p138_p1, %p137_p13  ;;  %s117_s28 = sld [smem:[#allocation4 + %s1706_s22]] }
  0x30   : > { %s173_s29 = ssub.s32 %s1259_s18, %s1706_s22  ;;  %s1708_s25 = smov (!%p115_p3, %s114_s25), 3 }
  0x31   : > { %s1678_s27 = scalar_select %p1395_p4, 1, 0 }
  0x32   : > { %p174_p5 = scmp.eq.s32.totalorder %s173_s29, 0  ;;  %s176_s30 = sadd.s32 1, %s1231_s11 }
  0x33   : > { %p186_p6 = scmp.ne.s32.totalorder %s1231_s11, %s1227_s10  ;;  %p187_p7 = scmp.eq.s32.totalorder %s797_s20, 5 }
  0x34   : > { %s1406_s8 = scalar_select %p174_p5, %s1231_s11, %s176_s30  }
  0x35   : > { %p1408_p8 = por %p187_p7, %p186_p6  ;;  %p192_p9 = scmp.ne.s32.totalorder %s1227_s10, %s1223_s1 }
  0x36   : > { %1679 = sst [smem:[#allocation23_spill]] %s1406_s8  ;;  %s118_s0 = sadd.s32 %s117_s28, %s1702_s21 }
  0x37   : > { %s1680_s9 = scalar_select %p1408_p8, 1, 0 }
  0x38   : > { %p193_p10 = scmp.eq.s32.totalorder %s798_s24, 5  ;;  %p119_p11 = scmp.lt.s32.totalorder %s118_s0, 3 }
  0x39   : > { %p950_p13 = scmp.lt.s32.totalorder %s1263_s19, 6  ;;  %s124_s29 = sadd.s32 1, %s1243_s14 }
  0x3a   : > { %p1415_p12 = por %p193_p10, %p192_p9  ;;  %s1710_s0 = smov (!%p119_p11, %s118_s0), 3 }
  0x3b   : > { %p1422_p0 = pnand %p950_p13, %p1389_p2  ;;  %s121_s23 = ssub.s32 %s1708_s25, %s1710_s0 }
  0x3c   : > { %s1681_s12 = scalar_select %p1415_p12, 1, 0 }
  0x3d   : > { %p122_p1 = scmp.eq.s32.totalorder %s121_s23, 0  ;;  %s262_s28 = sand.u32 1, %s1243_s14  }
  0x3e   : > { %s929_s30 = scalar_select %p1389_p2, [#allocation4], [#allocation12] }
  0x3f   : > { %s1429_s24 = scalar_select %p122_p1, %s1243_s14, %s124_s29  }
  0x40   : > { %s930_s22 = scalar_select %p1389_p2, %s1259_s18, 0 }
  0x41   : > { %1683 = sst [smem:[#allocation24_spill]] %s1429_s24  ;;  %s1712_s30 = smov (!%p950_p13, %s929_s30), [#allocation13] }
  0x42   : > { %s1714_s22 = smov (!%p950_p13, %s930_s22), 0  ;;  %s801_s8 = sshll.u32 %s262_s28, 7 }
  0x43   : > { %s267_s21 = sld [smem:[%s1712_s30 + %s1714_s22]]  ;;  %p804_p3 = scmp.ge.s32.totalorder %s1263_s19, 1 }
  0x44   : > { %p294_p5 = scmp.lt.s32.totalorder %s1263_s19, 7  ;;  %s266_s0 = scalar_lea.vmem [#allocation6], %s801_s8 }
  0x45   : > { %s277_s23 = sshll.u32 %s266_s0, 4  ;;  %s1450_s30 = scalar_lea.sflag [#allocation7], %s262_s28  ;;  %s1443_s23 = int_to_ptr.vmem [resolvable:$true] %s277_s23 }
  0x46   : > { %p1438_p6 = pnand %p804_p3, %p294_p5  ;;  %p1085_p9 = pneg %p1422_p0 }
  0x48   : > { %s1684_s11 = scalar_select %p1438_p6, 1, 0 }
  0x49   : > { %s268_s25 = sadd.s32 %s1255_s17, %s267_s21 }
  0x4a   : > { %p269_p7 = scmp.lt.s32.totalorder %s268_s25, 3 }
  0x4c   : > { %s1716_s25 = smov (!%p269_p7, %s268_s25), 3 }
  0x4d   : > { %s836_s26 = sshll.u32 %s1716_s25, 11  ;;  %s1088_s25 = scalar_lea.hbm %s1660_s4, 8192 }
  0x4e   : > { %s1448_s22 = scalar_lea.hbm %s1660_s4, %s836_s26 }
  0x4f   : > { %s1083_s24 = scalar_lea.hbm %s1448_s22, 2048  ;;  %p1089_p13 = scmp.lt.s32.totalorder %s1448_s22, %s1660_s4 }
  0x50   : > { %p1084_p2 = scmp.ne.s32.totalorder %s1448_s22, %s1083_s24  ;;  %p1090_p1 = scmp.lt.s32.totalorder %s1088_s25, %s1083_s24 }
  0x52   : > { %p1086_p10 = pnand %p1085_p9, %p1084_p2  ;;  %p1091_p3 = por %p1090_p1, %p1089_p13 }
  0x54   : > { %p1087_p11 = pneg %p1086_p10 }
  0x56   : > { %p1092_p5 = pnand %p1091_p3, %p1087_p11 }
  0x58   : > { %1095 = shalt.err (!%p1092_p5)
}
  0x59   : > { %s1096_s18 = scalar_lea.vmem %s1443_s23, 2048  ;;  %s1267_s28 = smov [#allocation6]  }
  0x5a   : > { %p1097_p7 = scmp.ne.s32.totalorder %s1443_s23, %s1096_s18  ;;  %s1101_s26 = sshll.u32 %s1267_s28, 4  ;;  %s1102_s26 = int_to_ptr.vmem [resolvable:$false] %s1101_s26 }
  0x5b   : > { %s1103_s29 = scalar_lea.vmem %s1102_s26, 4096  ;;  %p1104_p10 = scmp.lt.s32.totalorder %s1443_s23, %s1102_s26 }
  0x5c   : > { %p1099_p12 = pnand %p1097_p7, %p1085_p9  ;;  %p1105_p8 = scmp.lt.s32.totalorder %s1103_s29, %s1096_s18 }
  0x5e   : > { %p1100_p2 = pneg %p1099_p12  ;;  %p1106_p4 = por %p1105_p8, %p1104_p10 }
  0x60   : > { %p1107_p6 = pnand %p1106_p4, %p1100_p2 }
  0x62   : > { %1110 = shalt.err (!%p1107_p6)
}
  0x63   : > { %s1268_s17 = smov 128   ;;  %s1269_s24 = smov 8  }
  0x64   : > { %942 = dma.hbm_to_vmem [thread:$0]  (!%p1422_p0), %s1448_s22, 2048, %s1443_s23, %s1450_s30, %s1268_s17, %s1268_s17, %s1269_s24  }
  0x65   : > { %p1685_p9 = scmp.ne.s32.totalorder %s1684_s11, 0 }
  0x66   : > { %s300_s21 = sand.u32 (!%p1685_p9), 1, %s1239_s13   ;;  %p1686_p4 = scmp.ne.s32.totalorder (!%p1685_p9), %s1678_s27, 0 }
  0x67   : > { %298 = sbr.rel (%p1685_p9) target bundleno = 722 (0x2d2), region = 36  ;;  %s805_s8 = sshll.u32 (!%p1685_p9), %s300_s21, 7 }
  0x68   : > { %s301_s25 = scalar_lea.sflag (!%p1685_p9), [#allocation7], %s300_s21  ;;  %s1474_s0 = scalar_lea.vmem (!%p1685_p9), [#allocation6], %s805_s8 }
  0x6c   : > { %1210 = dma.done.wait (%p1686_p4), %s301_s25, 2048  }
  0x6d   : > { %1212 = vsyncadd (%p1686_p4), %s301_s25, 4294965248  ;;  %s1481_s20 = sand.u32 1, %s1227_s10   ;;  %s808_s11 = sshll.u32 %s1251_s16, 2 }
  0x6e   : > { %s359_s23 = sld [smem:[#allocation4 + %s1251_s16]]  ;;  %s806_s22 = sshll.u32 %s1481_s20, 5 }
  0x6f   : > { %p354_p8 = scmp.lt.s32.totalorder %s808_s11, 11  ;;  %p815_p0 = scmp.ne.s32.totalorder %s1247_s15, 0 }
  0x71   : > { %s1718_s11 = smov (!%p354_p8, %s808_s11), 11 }
  0x72   : > { %s809_s18 = sshll.u32 %s1718_s11, 3  ;;  %s1503_s11 = scalar_lea.vmem [#allocation9], %s806_s22 }
  0x73   : > { %s1490_s27 = scalar_lea.vmem %s1658_s2, %s809_s18  ;;  %s1495_s24 = scalar_lea.vmem %s1661_s5, %s809_s18 }
  0x74   : > { %s360_s30 = sadd.s32 %s1247_s15, %s359_s23  ;;  %s1505_s23 = scalar_lea.vmem [#allocation10], %s806_s22 }
  0x75   : > { %p361_p12 = scmp.lt.s32.totalorder %s360_s30, 3  ;;  %386 = sbr.rel (%p815_p0) target bundleno = 125 (0x7d), region = 44 }
  0x77   : > { %s1720_s30 = smov (!%p361_p12, %s360_s30), 3 }
  0x78   : > { %s1722_s30 = smov (!%p361_p12, %s1720_s30), 3 }
  0x79   : > { %s365_s25 = scalar_lea.vmem %s1659_s3, %s1722_s30 }
  0x7a   : > { %v1270_v0 = vmov 0.0  }
  0x7b   : > { %387 = vst [vmem:[#allocation2 + $0x10] sm:$0xff] %v1270_v0  ;;  %388 = vst [vmem:[#allocation2] sm:$0xff] %v1270_v0 }
  0x7c   : > { %389 = vst [vmem:[#allocation2 + $0x18] sm:$0xff] %v1270_v0  ;;  %390 = vst [vmem:[#allocation2 + $0x8] sm:$0xff] %v1270_v0 }
  0x7d PF: > { %s391_s18 = sld [smem:[#allocation5 + %s1251_s16]] }
  0x83   : > { %p816_p6 = scmp.ge.s32.totalorder %s1247_s15, %s391_s18 }
  0x84   : > { %s817_s22 = sshll.u32 (!%p816_p6), %s1251_s16, 5 }
  0x85   : > { %395 = sbr.rel (%p816_p6) target bundleno = 370 (0x172), region = 48 }
  0x8a   : > { %v443_v1 = vld [vmem:[%s1474_s0 + $0x78] sm:$0xff]  ;;  %v442_v2 = vld [vmem:[%s1474_s0 + $0x70] sm:$0xff]  ;;  %v441_v3 = vld [vmem:[%s1474_s0 + $0x68] sm:$0xff]  ;;  %v397_v10 = vlaneseq  ;;  %v403_v17 = vstv %s817_s22  ;;  %v1271_v28 = vmov 1.0  }
  0x8b   : > { %859 = vmatprep.subr.mxu0 %v443_v1  ;;  %897 = vmatprep.subr.mxu1 %v443_v1  ;;  %v440_v4 = vld [vmem:[%s1474_s0 + $0x60] sm:$0xff]  ;;  %v439_v5 = vld [vmem:[%s1474_s0 + $0x58] sm:$0xff]  ;;  %v438_v6 = vld [vmem:[%s1474_s0 + $0x50] sm:$0xff] }
  0x8c   : > { %860 = vmatpush3.msra.mxu0 %v443_v1  ;;  %913 = vmatpush3.msra.mxu1 %v443_v1  ;;  %v437_v7 = vld [vmem:[%s1474_s0 + $0x48] sm:$0xff]  ;;  %v436_v8 = vld [vmem:[%s1474_s0 + $0x40] sm:$0xff]  ;;  %v435_v9 = vld [vmem:[%s1474_s0 + $0x38] sm:$0xff]  ;;  %v398_v13 = vshrl.u32 %v397_v10, 7 }
  0x8d   : > { %861 = vmatprep.subr.mxu0 %v442_v2  ;;  %898 = vmatprep.subr.mxu1 %v442_v2  ;;  %v434_v11 = vld [vmem:[%s1474_s0 + $0x30] sm:$0xff]  ;;  %v433_v12 = vld [vmem:[%s1474_s0 + $0x28] sm:$0xff]  ;;  %v432_v14 = vld [vmem:[%s1474_s0 + $0x20] sm:$0xff] }
  0x8e   : > { %862 = vmatpush3.msra.mxu0 %v442_v2  ;;  %914 = vmatpush3.msra.mxu1 %v442_v2  ;;  %v431_v15 = vld [vmem:[%s1474_s0 + $0x18] sm:$0xff]  ;;  %v400_v16 = vadd.s32 16, %v398_v13  ;;  %v399_v18 = vadd.s32 8, %v398_v13  ;;  %v401_v19 = vadd.s32 24, %v398_v13  ;;  %v430_v20 = vld [vmem:[%s1474_s0 + $0x10] sm:$0xff]  ;;  %v429_v21 = vld [vmem:[%s1474_s0 + $0x8] sm:$0xff]  ;;  %v404_v22 = vadd.s32 %v403_v17, %v398_v13 }
  0x8f   : > { %863 = vmatprep.subr.mxu0 %v441_v3  ;;  %899 = vmatprep.subr.mxu1 %v441_v3  ;;  %v818_v24 = vld [vmem:[%s365_s25] ss:$0 sm:$0xff]  ;;  %v427_v30 = vld [vmem:[#allocation2 + $0x8] sm:$0xff]  ;;  %v424_v33 = vld [vmem:[#allocation2 + $0x10] sm:$0xff] }
  0x90   : > { %864 = vmatpush3.msra.mxu0 %v441_v3  ;;  %915 = vmatpush3.msra.mxu1 %v441_v3  ;;  %v406_v23 = vadd.s32 %v403_v17, %v400_v16  ;;  %v405_v25 = vadd.s32 %v403_v17, %v399_v18  ;;  %v407_v26 = vadd.s32 %v403_v17, %v401_v19  ;;  %v428_v27 = vld [vmem:[%s1474_s0] sm:$0xff]  ;;  %v426_v34 = vld [vmem:[#allocation2 + $0x18] sm:$0xff] }
  0x91   : > { %865 = vmatprep.subr.mxu0 %v440_v4  ;;  %900 = vmatprep.subr.mxu1 %v440_v4  ;;  %vm412_vm0 = vcmp.eq.s32.totalorder %v404_v22, %v818_v24  ;;  %v425_v29 = vld [vmem:[#allocation2] sm:$0xff] }
  0x92   : > { %866 = vmatpush3.msra.mxu0 %v440_v4  ;;  %916 = vmatpush3.msra.mxu1 %v440_v4  ;;  %vm414_vm1 = vcmp.eq.s32.totalorder %v406_v23, %v818_v24  ;;  %vm413_vm2 = vcmp.eq.s32.totalorder %v405_v25, %v818_v24  ;;  %vm415_vm3 = vcmp.eq.s32.totalorder %v407_v26, %v818_v24 }
  0x93   : > { %867 = vmatprep.subr.mxu0 %v439_v5  ;;  %901 = vmatprep.subr.mxu1 %v439_v5 }
  0x94   : > { %868 = vmatpush3.msra.mxu0 %v439_v5  ;;  %917 = vmatpush3.msra.mxu1 %v439_v5 }
  0x95   : > { %869 = vmatprep.subr.mxu0 %v438_v6  ;;  %902 = vmatprep.subr.mxu1 %v438_v6 }
  0x96   : > { %870 = vmatpush3.msra.mxu0 %v438_v6  ;;  %918 = vmatpush3.msra.mxu1 %v438_v6 }
  0x97   : > { %871 = vmatprep.subr.mxu0 %v437_v7  ;;  %903 = vmatprep.subr.mxu1 %v437_v7 }
  0x98   : > { %872 = vmatpush3.msra.mxu0 %v437_v7  ;;  %919 = vmatpush3.msra.mxu1 %v437_v7 }
  0x99   : > { %873 = vmatprep.subr.mxu0 %v436_v8  ;;  %904 = vmatprep.subr.mxu1 %v436_v8 }
  0x9a   : > { %874 = vmatpush3.msra.mxu0 %v436_v8  ;;  %920 = vmatpush3.msra.mxu1 %v436_v8 }
  0x9b   : > { %875 = vmatprep.subr.mxu0 %v435_v9  ;;  %905 = vmatprep.subr.mxu1 %v435_v9 }
  0x9c   : > { %876 = vmatpush3.msra.mxu0 %v435_v9  ;;  %921 = vmatpush3.msra.mxu1 %v435_v9 }
  0x9d   : > { %877 = vmatprep.subr.mxu0 %v434_v11  ;;  %906 = vmatprep.subr.mxu1 %v434_v11 }
  0x9e   : > { %878 = vmatpush3.msra.mxu0 %v434_v11  ;;  %922 = vmatpush3.msra.mxu1 %v434_v11 }
  0x9f   : > { %879 = vmatprep.subr.mxu0 %v433_v12  ;;  %907 = vmatprep.subr.mxu1 %v433_v12 }
  0xa0   : > { %880 = vmatpush3.msra.mxu0 %v433_v12  ;;  %923 = vmatpush3.msra.mxu1 %v433_v12 }
  0xa1   : > { %881 = vmatprep.subr.mxu0 %v432_v14  ;;  %908 = vmatprep.subr.mxu1 %v432_v14 }
  0xa2   : > { %882 = vmatpush3.msra.mxu0 %v432_v14  ;;  %924 = vmatpush3.msra.mxu1 %v432_v14 }
  0xa3   : > { %883 = vmatprep.subr.mxu0 %v431_v15  ;;  %909 = vmatprep.subr.mxu1 %v431_v15 }
  0xa4   : > { %884 = vmatpush3.msra.mxu0 %v431_v15  ;;  %925 = vmatpush3.msra.mxu1 %v431_v15 }
  0xa5   : > { %885 = vmatprep.subr.mxu0 %v430_v20  ;;  %910 = vmatprep.subr.mxu1 %v430_v20 }
  0xa6   : > { %886 = vmatpush3.msra.mxu0 %v430_v20  ;;  %926 = vmatpush3.msra.mxu1 %v430_v20 }
  0xa7   : > { %887 = vmatprep.subr.mxu0 %v429_v21  ;;  %911 = vmatprep.subr.mxu1 %v429_v21 }
  0xa8   : > { %888 = vmatpush3.msra.mxu0 %v429_v21  ;;  %927 = vmatpush3.msra.mxu1 %v429_v21 }
  0xa9   : > { %889 = vmatprep.subr.mxu0 %v428_v27  ;;  %912 = vmatprep.subr.mxu1 %v428_v27 }
  0xaa   : > { %890 = vmatpush3.msra.mxu0 %v428_v27  ;;  %928 = vmatpush3.msra.mxu1 %v428_v27 }
  0xab   : > { %891 = vmatprep.mubr.msk.f32.mxu0 %vm412_vm0, %v1271_v28  ;;  %894 = vmatprep.mubr.msk.f32.mxu1 %vm414_vm1, %v1271_v28 }
  0xac   : > { %892 = vmatmul.mubr.msk.f32.vlgmr.msra.gmra.mxu0 %vm413_vm2, %v1271_v28  ;;  %895 = vmatmul.mubr.msk.f32.vlgmr.msra.gmra.mxu1 %vm415_vm3, %v1271_v28 }
 0x16c   : > { %v893_v31 = vpop.f32.mrf.mxu0  ;;  %v896_v32 = vpop.f32.mrf.mxu1 }
 0x16d   : > { %v530_v35 = vadd.f32 %v893_v31, %v425_v29  ;;  %v532_v36 = vadd.f32 %v896_v32, %v427_v30 }
 0x16e   : > { %v510_v37 = vpop.f32.mrf.mxu0  ;;  %v520_v38 = vpop.f32.mrf.mxu1 }
 0x16f   : > { %534 = vst [vmem:[#allocation2] sm:$0xff] %v530_v35  ;;  %536 = vst [vmem:[#allocation2 + $0x8] sm:$0xff] %v532_v36  ;;  %v529_v39 = vadd.f32 %v510_v37, %v424_v33  ;;  %v531_v40 = vadd.f32 %v520_v38, %v426_v34 }
 0x171   : > { %533 = vst [vmem:[#allocation2 + $0x10] sm:$0xff] %v529_v39  ;;  %535 = vst [vmem:[#allocation2 + $0x18] sm:$0xff] %v531_v40 }
 0x172 PF: > { %p827_p11 = scmp.ne.s32.totalorder %s1247_s15, 1 }
 0x174   : > { %540 = sbr.rel (%p827_p11) target bundleno = 674 (0x2a2), region = 52 }
 0x179   : > { %v547_v41 = vld [vmem:[%s1490_s27 + $0x10] sm:$0xff]  ;;  %v545_v42 = vld [vmem:[%s1490_s27] sm:$0xff]  ;;  %v1272_v43 = vmov 0   ;;  %v548_v44 = vld [vmem:[%s1490_s27 + $0x18] sm:$0xff] }
 0x17a   : > { %1050 = vset.pattern.permute.xlu1 %v1272_v43  ;;  %1049 = vset.pattern.permute.xlu0 %v1272_v43  ;;  %v546_v45 = vld [vmem:[%s1490_s27 + $0x8] sm:$0xff]  ;;  %v543_v46 = vld [vmem:[#allocation2 + $0x18] sm:$0xff]  ;;  %v541_v47 = vld [vmem:[#allocation2 + $0x10] sm:$0xff] }
 0x17b   : > { %561 = vperm.xlu1 %1050, %v547_v41   ;;  %551 = vperm.xlu0 %1049, %v545_v42   ;;  %v542_v52 = vld [vmem:[#allocation2] sm:$0xff]  ;;  %v544_v55 = vld [vmem:[#allocation2 + $0x8] sm:$0xff]  ;;  %v603_v14 = vld [vmem:[%s1495_s24 + $0x10] sm:$0xff] }
 0x17c   : > { %v601_v7 = vld [vmem:[%s1495_s24] sm:$0xff]  ;;  %v602_v11 = vld [vmem:[%s1495_s24 + $0x8] sm:$0xff]  ;;  %v604_v19 = vld [vmem:[%s1495_s24 + $0x18] sm:$0xff] }
 0x17f   : > { %566 = vperm.xlu1 %1050, %v548_v44   ;;  %556 = vperm.xlu0 %1049, %v546_v45  }
 0x1f6   : > { %v562_v48 = vpop.permute.xlu1 %561  ;;  %v552_v49 = vpop.permute.xlu0 %551 }
 0x1f7   : > { %v571_v50 = vmul.f32 %v562_v48, %v543_v46  ;;  %v569_v51 = vmul.f32 %v552_v49, %v541_v47 }
 0x1f9   : > { %v573_v53 = vmul.f32 %v569_v51, %v569_v51  ;;  %v575_v58 = vmul.f32 %v571_v50, %v571_v50 }
 0x1fa   : > { %v567_v54 = vpop.permute.xlu1 %566  ;;  %v557_v56 = vpop.permute.xlu0 %556 }
 0x1fb   : > { %v570_v57 = vmul.f32 %v557_v56, %v542_v52  ;;  %577 = vadd.xlane.f32.xlu0 %v573_v53  ;;  %v572_v59 = vmul.f32 %v567_v54, %v544_v55 }
 0x1fd   : > { %v574_v60 = vmul.f32 %v570_v57, %v570_v57  ;;  %v576_v61 = vmul.f32 %v572_v59, %v572_v59 }
 0x1ff   : > { %579 = vadd.xlane.f32.xlu1 %v574_v60  ;;  %581 = vadd.xlane.f32.xlu0 %v575_v58 }
 0x203   : > { %583 = vadd.xlane.f32.xlu0 %v576_v61 }
 0x284   : > { %v578_v62 = vpop.xlane.xlu0 %577 }
 0x285   : > { %v585_v63 = vmax.f32 %v578_v62, 1e-24 }
 0x287   : > { %1051 = vrsqrt.f32 %v585_v63 }
 0x288   : > { %v580_v0 = vpop.xlane.xlu1 %579  ;;  %v582_v1 = vpop.xlane.xlu0 %581 }
 0x289   : > { %v586_v2 = vmax.f32 %v580_v0, 1e-24  ;;  %v587_v3 = vmax.f32 %v582_v1, 1e-24 }
 0x28b   : > { %1053 = vrsqrt.f32 %v586_v2 }
 0x28c   : > { %1055 = vrsqrt.f32 %v587_v3  ;;  %v584_v4 = vpop.xlane.xlu0 %583 }
 0x28d   : > { %v588_v5 = vmax.f32 %v584_v4, 1e-24 }
 0x28f   : > { %1057 = vrsqrt.f32 %v588_v5 }
 0x294   : > { %v1052_v6 = vpop.eup %1051 }
 0x295   : > { %v593_v8 = vmul.f32 %v1052_v6, %v569_v51 }
 0x297   : > { %597 = vst [vmem:[%s1503_s11] sm:$0xff] %v593_v8  ;;  %v605_v9 = vadd.f32 %v601_v7, %v593_v8 }
 0x298   : > { %v1054_v10 = vpop.eup %1053 }
 0x299   : > { %v1056_v12 = vpop.eup %1055  ;;  %609 = vst [vmem:[%s1505_s23] sm:$0xff] %v605_v9  ;;  %v594_v13 = vmul.f32 %v1054_v10, %v570_v57 }
 0x29a   : > { %v595_v15 = vmul.f32 %v1056_v12, %v571_v50 }
 0x29b   : > { %598 = vst [vmem:[%s1503_s11 + $0x8] sm:$0xff] %v594_v13  ;;  %v606_v16 = vadd.f32 %v602_v11, %v594_v13 }
 0x29c   : > { %v1058_v17 = vpop.eup %1057  ;;  %599 = vst [vmem:[%s1503_s11 + $0x10] sm:$0xff] %v595_v15  ;;  %v607_v18 = vadd.f32 %v603_v14, %v595_v15 }
 0x29d   : > { %610 = vst [vmem:[%s1505_s23 + $0x8] sm:$0xff] %v606_v16  ;;  %v596_v20 = vmul.f32 %v1058_v17, %v572_v59 }
 0x29e   : > { %611 = vst [vmem:[%s1505_s23 + $0x10] sm:$0xff] %v607_v18 }
 0x29f   : > { %600 = vst [vmem:[%s1503_s11 + $0x18] sm:$0xff] %v596_v20  ;;  %v608_v21 = vadd.f32 %v604_v19, %v596_v20 }
 0x2a1   : > { %612 = vst [vmem:[%s1505_s23 + $0x18] sm:$0xff] %v608_v21 }
 0x2a2 PF: > { %s837_s15 = sshll.u32 %s1251_s16, 9  ;;  %s632_s29 = sshll.u32 %s1503_s11, 4  ;;  %s1558_s29 = int_to_ptr.vmem [resolvable:$true] %s632_s29 }
 0x2a3   : > { %s1555_s27 = scalar_lea.hbm %s1662_s6, %s837_s15  ;;  %s614_s17 = scalar_lea.sflag [#allocation8], %s1481_s20 }
 0x2a4   : > { %s1111_s24 = scalar_lea.vmem %s1558_s29, 512  ;;  %p1687_p1 = scmp.ne.s32.totalorder %s1680_s9, 0 }
 0x2a5   : > { %p1112_p13 = scmp.ne.s32.totalorder %s1558_s29, %s1111_s24  ;;  %s1273_s21 = smov [#allocation9]  }
 0x2a6   : > { %s1115_s8 = sshll.u32 %s1273_s21, 4  ;;  %s1116_s8 = int_to_ptr.vmem [resolvable:$false] %s1115_s8 }
 0x2a7   : > { %p1113_p3 = pnand %p1112_p13, %p1687_p1  ;;  %s1117_s25 = scalar_lea.vmem %s1116_s8, 1024 }
 0x2a8   : > { %p1118_p7 = scmp.lt.s32.totalorder %s1558_s29, %s1116_s8  ;;  %p1119_p2 = scmp.lt.s32.totalorder %s1117_s25, %s1111_s24 }
 0x2a9   : > { %p1114_p5 = pneg %p1113_p3 }
 0x2aa   : > { %p1120_p10 = por %p1119_p2, %p1118_p7 }
 0x2ac   : > { %p1121_p9 = pnand %p1120_p10, %p1114_p5 }
 0x2ae   : > { %1124 = shalt.err (!%p1121_p9)
}
 0x2af   : > { %s1125_s11 = scalar_lea.hbm %s1555_s27, 512  ;;  %s1129_s28 = scalar_lea.hbm %s1662_s6, 1536 }
 0x2b0   : > { %p1126_p4 = scmp.ne.s32.totalorder %s1555_s27, %s1125_s11  ;;  %p1130_p0 = scmp.lt.s32.totalorder %s1555_s27, %s1662_s6 }
 0x2b1   : > { %p1131_p6 = scmp.lt.s32.totalorder %s1129_s28, %s1125_s11 }
 0x2b2   : > { %p1127_p8 = pnand %p1126_p4, %p1687_p1 }
 0x2b3   : > { %p1132_p11 = por %p1131_p6, %p1130_p0 }
 0x2b4   : > { %p1128_p12 = pneg %p1127_p8 }
 0x2b6   : > { %p1133_p13 = pnand %p1132_p11, %p1128_p12 }
 0x2b8   : > { %1136 = shalt.err (!%p1133_p13)
}
 0x2b9   : > { %s1274_s30 = smov 128   ;;  %s1275_s24 = smov 8  }
 0x2ba   : > { %933 = dma.vmem_to_hbm [thread:$0]  (%p1687_p1), %s1558_s29, 512, %s1555_s27, %s614_s17, %s1274_s30, %s1274_s30, %s1275_s24  }
 0x2bb   : > { %s1591_s25 = scalar_lea.hbm %s1663_s7, %s837_s15  ;;  %s648_s11 = sshll.u32 %s1505_s23, 4  ;;  %s1594_s11 = int_to_ptr.vmem [resolvable:$true] %s648_s11 }
 0x2bc   : > { %s619_s18 = scalar_lea.sflag [#allocation11], %s1481_s20  ;;  %s1137_s22 = scalar_lea.vmem %s1594_s11, 512 }
 0x2bd   : > { %p1138_p3 = scmp.ne.s32.totalorder %s1594_s11, %s1137_s22  ;;  %s1276_s28 = smov [#allocation10]  }
 0x2be   : > { %s1141_s27 = sshll.u32 %s1276_s28, 4  ;;  %s1142_s27 = int_to_ptr.vmem [resolvable:$false] %s1141_s27 }
 0x2bf   : > { %p1139_p5 = pnand %p1138_p3, %p1687_p1  ;;  %s1143_s16 = scalar_lea.vmem %s1142_s27, 1024 }
 0x2c0   : > { %p1144_p2 = scmp.lt.s32.totalorder %s1594_s11, %s1142_s27  ;;  %p1145_p10 = scmp.lt.s32.totalorder %s1143_s16, %s1137_s22 }
 0x2c1   : > { %p1140_p7 = pneg %p1139_p5 }
 0x2c2   : > { %p1146_p9 = por %p1145_p10, %p1144_p2 }
 0x2c4   : > { %p1147_p4 = pnand %p1146_p9, %p1140_p7 }
 0x2c6   : > { %1150 = shalt.err (!%p1147_p4)
}
 0x2c7   : > { %s1151_s23 = scalar_lea.hbm %s1591_s25, 512  ;;  %s1155_s29 = scalar_lea.hbm %s1663_s7, 1536 }
 0x2c8   : > { %p1152_p8 = scmp.ne.s32.totalorder %s1591_s25, %s1151_s23  ;;  %p1156_p6 = scmp.lt.s32.totalorder %s1591_s25, %s1663_s7 }
 0x2c9   : > { %p1157_p11 = scmp.lt.s32.totalorder %s1155_s29, %s1151_s23 }
 0x2ca   : > { %p1153_p12 = pnand %p1152_p8, %p1687_p1 }
 0x2cb   : > { %p1158_p13 = por %p1157_p11, %p1156_p6 }
 0x2cc   : > { %p1154_p0 = pneg %p1153_p12 }
 0x2ce   : > { %p1159_p3 = pnand %p1158_p13, %p1154_p0 }
 0x2d0   : > { %1162 = shalt.err (!%p1159_p3)
}
 0x2d1   : > { %934 = dma.vmem_to_hbm [thread:$0]  (%p1687_p1), %s1594_s11, 512, %s1591_s25, %s619_s18, %s1274_s30, %s1274_s30, %s1275_s24  }
 0x2d2 PF: > { %p951_p5 = scmp.ge.s32.totalorder %s1263_s19, 2  ;;  %s663_s0 = sand.u32 1, %s1223_s1  }
 0x2d3   : > { %p1688_p7 = scmp.ne.s32.totalorder %s1681_s12, 0  ;;  %s664_s21 = scalar_lea.sflag [#allocation8], %s663_s0 }
 0x2d5   : > { %p944_p2 = pnand %p951_p5, %p1688_p7 }
 0x2d7   : > { %p945_p10 = pneg %p944_p2 }
 0x2d9   : > { %1214 = dma.done.wait (%p945_p10), %s664_s21, 512  }
 0x2da   : > { %1216 = vsyncadd (%p945_p10), %s664_s21, 4294966784  ;;  %s673_s8 = scalar_lea.sflag [#allocation11], %s663_s0 }
 0x2db   : > { %1218 = dma.done.wait (%p945_p10), %s673_s8, 512  }
 0x2dc   : > { %1220 = vsyncadd (%p945_p10), %s673_s8, 4294966784  ;;  %s37_s19 = sadd.s32 1, %s1263_s19   ;;  %s1689_s9 = sld [smem:[#allocation18_spill]] }
 0x2dd   : > { %p34_p9 = scmp.ge.s32.totalorder %s37_s19, 8   ;;  %s1690_s11 = sld [smem:[#allocation23_spill]] }
 0x2de   : > { %s1691_s30 = sld [smem:[#allocation24_spill]]  ;;  %s1696_s1 = smov %s1227_s10 }
 0x2df   : > { %s1692_s15 = sld [smem:[#allocation19_spill]]  ;;  %s1698_s12 = smov %s1239_s13 }
 0x2e0   : > { %s1693_s16 = sld [smem:[#allocation20_spill]]  ;;  %s1699_s13 = smov %s1243_s14 }
 0x2e1   : > { %s1694_s17 = sld [smem:[#allocation21_spill]]  ;;  %36 = sbr.rel (!%p34_p9) target bundleno = 36 (0x24), region = 119 }
 0x2e2   : > { %s1695_s18 = sld [smem:[#allocation22_spill]]  ;;  %s1697_s10 = smov %s1689_s9 }
 0x2e4   : > { %s1700_s14 = smov %s1691_s30 }
 0x2e6   :  { %678 = vsyncpa [#allocation7], 1 }
 0x2e7   :  { %680 = vsyncpa [#allocation7 + $0x1], 1 }
 0x2e8   :  { %681 = vsyncpa [#allocation8], 1 }
 0x2e9   :  { %683 = vsyncpa [#allocation8 + $0x1], 1 }
 0x2ea   :  { %684 = vsyncpa [#allocation11], 1 }
 0x2eb   :  { %686 = vsyncpa [#allocation11 + $0x1], 1 }

</bundles_post_ra>
